<compile_context>
chip_gen: v6e
topology: v6e:2x2x1
jax: 0.10.0
libtpu: 0.0.40
codegen_flags: <defaults>
</compile_context>

<pallas_src>
import jax
import jax.numpy as jnp
from jax.experimental import pallas as pl
from jax.experimental.pallas import tpu as pltpu

STATE_DIM = 6
HIDDEN_DIM = 2
ACTION_DIM = 2
LANES = 128


def policy_nn_kernel(x_ref, w1_ref, b1_ref, w2_ref, b2_ref, o_ref):
    """One batch block with batch on (sublane, lane).

    x_ref : (6, RB, 128)  VMEM  -- batch index = row*128 + lane
    w1_ref: (6, 2)        SMEM  -- l1.weight stored as (in, out)
    b1_ref: (2,)          SMEM
    w2_ref: (2, 2)        SMEM  -- l2.weight stored as (in, out)
    b2_ref: (2,)          SMEM
    o_ref : (2, RB, 128)  VMEM  -- softmax probabilities
    """
    # Load each feature slab once as a full (RB, 128) tile (dense vld).
    xs = [x_ref[k].astype(jnp.float32) for k in range(STATE_DIM)]

    # ---- Layer 1: Linear(6 -> 2) + ReLU, unrolled full-slab VPU FMAs ------
    h = []
    for j in range(HIDDEN_DIM):
        acc = xs[0] * w1_ref[0, j]
        for k in range(1, STATE_DIM):
            acc = acc + xs[k] * w1_ref[k, j]
        h.append(jnp.maximum(acc + b1_ref[j], 0.0))        # (RB, 128)

    # ---- Layer 2: Linear(2 -> 2), 4 FMAs ----------------------------------
    l0 = h[0] * w2_ref[0, 0] + h[1] * w2_ref[1, 0] + b2_ref[0]
    l1 = h[0] * w2_ref[0, 1] + h[1] * w2_ref[1, 1] + b2_ref[1]

    # ---- 2-class softmax, logistic form (stable, exact reciprocal) --------
    # p1 = exp(l1) / (exp(l0) + exp(l1)) = 1 / (1 + exp(l0 - l1))
    p1 = pl.reciprocal(1.0 + jnp.exp(l0 - l1), approx=False)
    p0 = 1.0 - p1                                          # rows sum exactly to 1

    # Two dense full-slab stores (unmasked vst).
    o_ref[0] = p0.astype(o_ref.dtype)
    o_ref[1] = p1.astype(o_ref.dtype)


def policy_nn_forward_packed(x_packed, w1, b1, w2, b2, *, block_rows=512):
    """Fast path: batch already packed as (6, rows, 128) -> (2, rows, 128).

    No wrapper HBM passes; produce/consume this layout upstream when possible.
    """
    feat, rows, lanes = x_packed.shape
    assert feat == STATE_DIM and lanes == LANES

    if block_rows >= rows:
        rb = rows                       # single block (block dim == array dim)
    else:
        rb = max((block_rows // 8) * 8, 8)   # (8,128)-aligned tile
    grid = pl.cdiv(rows, rb)            # ragged last block handled by Pallas
                                        # (OOB reads are padded, OOB stores masked)

    smem = pl.BlockSpec(memory_space=pltpu.MemorySpace.SMEM)

    return pl.pallas_call(
        policy_nn_kernel,
        out_shape=jax.ShapeDtypeStruct((ACTION_DIM, rows, LANES), jnp.float32),
        grid=(grid,),
        in_specs=[
            pl.BlockSpec((STATE_DIM, rb, LANES), lambda i: (0, i, 0)),
            smem,  # w1 (20 scalars total live in SMEM, read as broadcast scalars)
            smem,  # b1
            smem,  # w2
            smem,  # b2
        ],
        out_specs=pl.BlockSpec((ACTION_DIM, rb, LANES), lambda i: (0, i, 0)),
        compiler_params=pltpu.CompilerParams(
            # Parallel batch axis: pipelined double-buffering + megacore /
            # v7x dual-TensorCore sharding (keep grid >= 2 at large B).
            dimension_semantics=("parallel",),
        ),
    )(x_packed, w1, b1, w2, b2)


def policy_nn_forward(x, w1, b1, w2, b2, *, block_rows=512):
    """Convenience wrapper matching Policy_NN.forward: (B, 6) -> (B, 2).

    Does one pack pass ((B,6) -> (6, rows, 128)) and one unpack pass; for
    peak throughput keep data in the packed layout and call
    policy_nn_forward_packed directly.
    """
    B = x.shape[0]
    rows = pl.cdiv(max(B, 1), LANES)
    pb = rows * LANES
    x_packed = jnp.pad(x, ((0, pb - B), (0, 0))).T.reshape(STATE_DIM, rows, LANES)
    out_packed = policy_nn_forward_packed(x_packed, w1, b1, w2, b2,
                                          block_rows=block_rows)
    return out_packed.reshape(ACTION_DIM, pb).T[:B]         # (B, 2)


def init_params(key):
    """Deterministic init mimicking nn.Linear (weights stored as (in, out))."""
    k1, k2, k3, k4 = jax.random.split(key, 4)
    bound1 = 1.0 / jnp.sqrt(6.0)   # U(-1/sqrt(fan_in), +), PyTorch default
    bound2 = 1.0 / jnp.sqrt(2.0)
    w1 = jax.random.uniform(k1, (STATE_DIM, HIDDEN_DIM), jnp.float32, -bound1, bound1)
    b1 = jax.random.uniform(k2, (HIDDEN_DIM,), jnp.float32, -bound1, bound1)
    w2 = jax.random.uniform(k3, (HIDDEN_DIM, ACTION_DIM), jnp.float32, -bound2, bound2)
    b2 = jax.random.uniform(k4, (ACTION_DIM,), jnp.float32, -bound2, bound2)
    return w1, b1, w2, b2


def reference_forward(x, w1, b1, w2, b2):
    h = jnp.maximum(x.astype(jnp.float32) @ w1 + b1, 0.0)
    logits = h @ w2 + b2
    return jax.nn.softmax(logits, axis=-1)


if __name__ == "__main__":
    key = jax.random.PRNGKey(0)
    kx, kp, kx2 = jax.random.split(key, 3)
    w1, b1, w2, b2 = init_params(kp)

    # --- Small batch consistent with the module (state=6, action=2) --------
    B = 8
    x = jax.random.normal(kx, (B, STATE_DIM), jnp.float32)
    out = policy_nn_forward(x, w1, b1, w2, b2)
    out = jax.block_until_ready(out)
    ref = reference_forward(x, w1, b1, w2, b2)
    assert out.shape == (B, ACTION_DIM)
    assert jnp.allclose(out, ref, atol=1e-5, rtol=1e-5), float(jnp.max(jnp.abs(out - ref)))
    assert jnp.allclose(jnp.sum(out, axis=-1), 1.0, atol=1e-6)

    # --- Exercise the tiled path: grid > 1 with a ragged last block --------
    B2 = 2500                                   # rows=20, rb=8 -> grid=3 (ragged)
    x2 = jax.random.normal(kx2, (B2, STATE_DIM), jnp.float32)
    out2 = policy_nn_forward(x2, w1, b1, w2, b2, block_rows=8)
    out2 = jax.block_until_ready(out2)
    ref2 = reference_forward(x2, w1, b1, w2, b2)
    assert out2.shape == (B2, ACTION_DIM)
    assert jnp.allclose(out2, ref2, atol=1e-5, rtol=1e-5), float(jnp.max(jnp.abs(out2 - ref2)))
    assert jnp.allclose(jnp.sum(out2, axis=-1), 1.0, atol=1e-6)

    print("KERNEL_OK")
</pallas_src>

<mosaic_0001>
module attributes {stable_mosaic.version = 11 : i64} {
  func.func @policy_nn_kernel(%arg0: i32, %arg1: memref<6x1x128xf32, #tpu.memory_space<vmem>>, %arg2: memref<6x2xf32, #tpu.memory_space<smem>>, %arg3: memref<2xf32, #tpu.memory_space<smem>>, %arg4: memref<2x2xf32, #tpu.memory_space<smem>>, %arg5: memref<2xf32, #tpu.memory_space<smem>>, %arg6: memref<2x1x128xf32, #tpu.memory_space<vmem>>) attributes {dimension_semantics = [#tpu.dimension_semantics<parallel>], iteration_bounds = array<i64: 1>, scalar_prefetch = 0 : i64, scratch_operands = 0 : i64, tpu.core_type = #tpu.core_type<tc>, window_params = [{transform_indices = @transform_0, window_bounds = array<i64: 6, 1, 128>}, {transform_indices = @transform_1, window_bounds = array<i64: 6, 2>}, {transform_indices = @transform_2, window_bounds = array<i64: 2>}, {transform_indices = @transform_3, window_bounds = array<i64: 2, 2>}, {transform_indices = @transform_4, window_bounds = array<i64: 2>}, {transform_indices = @transform_5, window_bounds = array<i64: 2, 1, 128>}]} {
    %c0 = arith.constant 0 : index
    %c0_0 = arith.constant 0 : index
    %c0_1 = arith.constant 0 : index
    %0 = vector.load %arg1[%c0, %c0_0, %c0_1] : memref<6x1x128xf32, #tpu.memory_space<vmem>>, vector<1x1x128xf32>
    %1 = vector.shape_cast %0 : vector<1x1x128xf32> to vector<1x128xf32>
    %c1 = arith.constant 1 : index
    %c0_2 = arith.constant 0 : index
    %c0_3 = arith.constant 0 : index
    %2 = vector.load %arg1[%c1, %c0_2, %c0_3] : memref<6x1x128xf32, #tpu.memory_space<vmem>>, vector<1x1x128xf32>
    %3 = vector.shape_cast %2 : vector<1x1x128xf32> to vector<1x128xf32>
    %c2 = arith.constant 2 : index
    %c0_4 = arith.constant 0 : index
    %c0_5 = arith.constant 0 : index
    %4 = vector.load %arg1[%c2, %c0_4, %c0_5] : memref<6x1x128xf32, #tpu.memory_space<vmem>>, vector<1x1x128xf32>
    %5 = vector.shape_cast %4 : vector<1x1x128xf32> to vector<1x128xf32>
    %c3 = arith.constant 3 : index
    %c0_6 = arith.constant 0 : index
    %c0_7 = arith.constant 0 : index
    %6 = vector.load %arg1[%c3, %c0_6, %c0_7] : memref<6x1x128xf32, #tpu.memory_space<vmem>>, vector<1x1x128xf32>
    %7 = vector.shape_cast %6 : vector<1x1x128xf32> to vector<1x128xf32>
    %c4 = arith.constant 4 : index
    %c0_8 = arith.constant 0 : index
    %c0_9 = arith.constant 0 : index
    %8 = vector.load %arg1[%c4, %c0_8, %c0_9] : memref<6x1x128xf32, #tpu.memory_space<vmem>>, vector<1x1x128xf32>
    %9 = vector.shape_cast %8 : vector<1x1x128xf32> to vector<1x128xf32>
    %c5 = arith.constant 5 : index
    %c0_10 = arith.constant 0 : index
    %c0_11 = arith.constant 0 : index
    %10 = vector.load %arg1[%c5, %c0_10, %c0_11] : memref<6x1x128xf32, #tpu.memory_space<vmem>>, vector<1x1x128xf32>
    %11 = vector.shape_cast %10 : vector<1x1x128xf32> to vector<1x128xf32>
    %c0_12 = arith.constant 0 : index
    %c0_13 = arith.constant 0 : index
    %12 = memref.load %arg2[%c0_12, %c0_13] : memref<6x2xf32, #tpu.memory_space<smem>>
    %13 = vector.broadcast %12 : f32 to vector<1x128xf32>
    %14 = arith.mulf %1, %13 : vector<1x128xf32>
    %c1_14 = arith.constant 1 : index
    %c0_15 = arith.constant 0 : index
    %15 = memref.load %arg2[%c1_14, %c0_15] : memref<6x2xf32, #tpu.memory_space<smem>>
    %16 = vector.broadcast %15 : f32 to vector<1x128xf32>
    %17 = arith.mulf %3, %16 : vector<1x128xf32>
    %18 = arith.addf %14, %17 : vector<1x128xf32>
    %c2_16 = arith.constant 2 : index
    %c0_17 = arith.constant 0 : index
    %19 = memref.load %arg2[%c2_16, %c0_17] : memref<6x2xf32, #tpu.memory_space<smem>>
    %20 = vector.broadcast %19 : f32 to vector<1x128xf32>
    %21 = arith.mulf %5, %20 : vector<1x128xf32>
    %22 = arith.addf %18, %21 : vector<1x128xf32>
    %c3_18 = arith.constant 3 : index
    %c0_19 = arith.constant 0 : index
    %23 = memref.load %arg2[%c3_18, %c0_19] : memref<6x2xf32, #tpu.memory_space<smem>>
    %24 = vector.broadcast %23 : f32 to vector<1x128xf32>
    %25 = arith.mulf %7, %24 : vector<1x128xf32>
    %26 = arith.addf %22, %25 : vector<1x128xf32>
    %c4_20 = arith.constant 4 : index
    %c0_21 = arith.constant 0 : index
    %27 = memref.load %arg2[%c4_20, %c0_21] : memref<6x2xf32, #tpu.memory_space<smem>>
    %28 = vector.broadcast %27 : f32 to vector<1x128xf32>
    %29 = arith.mulf %9, %28 : vector<1x128xf32>
    %30 = arith.addf %26, %29 : vector<1x128xf32>
    %c5_22 = arith.constant 5 : index
    %c0_23 = arith.constant 0 : index
    %31 = memref.load %arg2[%c5_22, %c0_23] : memref<6x2xf32, #tpu.memory_space<smem>>
    %32 = vector.broadcast %31 : f32 to vector<1x128xf32>
    %33 = arith.mulf %11, %32 : vector<1x128xf32>
    %34 = arith.addf %30, %33 : vector<1x128xf32>
    %c0_24 = arith.constant 0 : index
    %35 = memref.load %arg3[%c0_24] : memref<2xf32, #tpu.memory_space<smem>>
    %36 = vector.broadcast %35 : f32 to vector<1x128xf32>
    %37 = arith.addf %34, %36 : vector<1x128xf32>
    %cst = arith.constant 0.000000e+00 : f32
    %38 = vector.broadcast %cst : f32 to vector<1x128xf32>
    %39 = arith.maximumf %37, %38 : vector<1x128xf32>
    %c0_25 = arith.constant 0 : index
    %c1_26 = arith.constant 1 : index
    %40 = memref.load %arg2[%c0_25, %c1_26] : memref<6x2xf32, #tpu.memory_space<smem>>
    %41 = vector.broadcast %40 : f32 to vector<1x128xf32>
    %42 = arith.mulf %1, %41 : vector<1x128xf32>
    %c1_27 = arith.constant 1 : index
    %c1_28 = arith.constant 1 : index
    %43 = memref.load %arg2[%c1_27, %c1_28] : memref<6x2xf32, #tpu.memory_space<smem>>
    %44 = vector.broadcast %43 : f32 to vector<1x128xf32>
    %45 = arith.mulf %3, %44 : vector<1x128xf32>
    %46 = arith.addf %42, %45 : vector<1x128xf32>
    %c2_29 = arith.constant 2 : index
    %c1_30 = arith.constant 1 : index
    %47 = memref.load %arg2[%c2_29, %c1_30] : memref<6x2xf32, #tpu.memory_space<smem>>
    %48 = vector.broadcast %47 : f32 to vector<1x128xf32>
    %49 = arith.mulf %5, %48 : vector<1x128xf32>
    %50 = arith.addf %46, %49 : vector<1x128xf32>
    %c3_31 = arith.constant 3 : index
    %c1_32 = arith.constant 1 : index
    %51 = memref.load %arg2[%c3_31, %c1_32] : memref<6x2xf32, #tpu.memory_space<smem>>
    %52 = vector.broadcast %51 : f32 to vector<1x128xf32>
    %53 = arith.mulf %7, %52 : vector<1x128xf32>
    %54 = arith.addf %50, %53 : vector<1x128xf32>
    %c4_33 = arith.constant 4 : index
    %c1_34 = arith.constant 1 : index
    %55 = memref.load %arg2[%c4_33, %c1_34] : memref<6x2xf32, #tpu.memory_space<smem>>
    %56 = vector.broadcast %55 : f32 to vector<1x128xf32>
    %57 = arith.mulf %9, %56 : vector<1x128xf32>
    %58 = arith.addf %54, %57 : vector<1x128xf32>
    %c5_35 = arith.constant 5 : index
    %c1_36 = arith.constant 1 : index
    %59 = memref.load %arg2[%c5_35, %c1_36] : memref<6x2xf32, #tpu.memory_space<smem>>
    %60 = vector.broadcast %59 : f32 to vector<1x128xf32>
    %61 = arith.mulf %11, %60 : vector<1x128xf32>
    %62 = arith.addf %58, %61 : vector<1x128xf32>
    %c1_37 = arith.constant 1 : index
    %63 = memref.load %arg3[%c1_37] : memref<2xf32, #tpu.memory_space<smem>>
    %64 = vector.broadcast %63 : f32 to vector<1x128xf32>
    %65 = arith.addf %62, %64 : vector<1x128xf32>
    %cst_38 = arith.constant 0.000000e+00 : f32
    %66 = vector.broadcast %cst_38 : f32 to vector<1x128xf32>
    %67 = arith.maximumf %65, %66 : vector<1x128xf32>
    %c0_39 = arith.constant 0 : index
    %c0_40 = arith.constant 0 : index
    %68 = memref.load %arg4[%c0_39, %c0_40] : memref<2x2xf32, #tpu.memory_space<smem>>
    %69 = vector.broadcast %68 : f32 to vector<1x128xf32>
    %70 = arith.mulf %39, %69 : vector<1x128xf32>
    %c1_41 = arith.constant 1 : index
    %c0_42 = arith.constant 0 : index
    %71 = memref.load %arg4[%c1_41, %c0_42] : memref<2x2xf32, #tpu.memory_space<smem>>
    %72 = vector.broadcast %71 : f32 to vector<1x128xf32>
    %73 = arith.mulf %67, %72 : vector<1x128xf32>
    %74 = arith.addf %70, %73 : vector<1x128xf32>
    %c0_43 = arith.constant 0 : index
    %75 = memref.load %arg5[%c0_43] : memref<2xf32, #tpu.memory_space<smem>>
    %76 = vector.broadcast %75 : f32 to vector<1x128xf32>
    %77 = arith.addf %74, %76 : vector<1x128xf32>
    %c0_44 = arith.constant 0 : index
    %c1_45 = arith.constant 1 : index
    %78 = memref.load %arg4[%c0_44, %c1_45] : memref<2x2xf32, #tpu.memory_space<smem>>
    %79 = vector.broadcast %78 : f32 to vector<1x128xf32>
    %80 = arith.mulf %39, %79 : vector<1x128xf32>
    %c1_46 = arith.constant 1 : index
    %c1_47 = arith.constant 1 : index
    %81 = memref.load %arg4[%c1_46, %c1_47] : memref<2x2xf32, #tpu.memory_space<smem>>
    %82 = vector.broadcast %81 : f32 to vector<1x128xf32>
    %83 = arith.mulf %67, %82 : vector<1x128xf32>
    %84 = arith.addf %80, %83 : vector<1x128xf32>
    %c1_48 = arith.constant 1 : index
    %85 = memref.load %arg5[%c1_48] : memref<2xf32, #tpu.memory_space<smem>>
    %86 = vector.broadcast %85 : f32 to vector<1x128xf32>
    %87 = arith.addf %84, %86 : vector<1x128xf32>
    %88 = arith.subf %77, %87 : vector<1x128xf32>
    %89 = math.exp %88 : vector<1x128xf32>
    %cst_49 = arith.constant 1.000000e+00 : f32
    %90 = vector.broadcast %cst_49 : f32 to vector<1x128xf32>
    %91 = arith.addf %90, %89 : vector<1x128xf32>
    %92 = tpu.reciprocal %91 : vector<1x128xf32> -> vector<1x128xf32>
    %cst_50 = arith.constant 1.000000e+00 : f32
    %93 = vector.broadcast %cst_50 : f32 to vector<1x128xf32>
    %94 = arith.subf %93, %92 : vector<1x128xf32>
    %c0_51 = arith.constant 0 : index
    %c0_52 = arith.constant 0 : index
    %c0_53 = arith.constant 0 : index
    %95 = vector.load %arg6[%c0_51, %c0_52, %c0_53] : memref<2x1x128xf32, #tpu.memory_space<vmem>>, vector<1x1x128xf32>
    %96 = vector.shape_cast %95 : vector<1x1x128xf32> to vector<1x128xf32>
    %97 = vector.shape_cast %94 : vector<1x128xf32> to vector<1x1x128xf32>
    tpu.vector_store %arg6[%c0_51, %c0_52, %c0_53], %97 {strides = array<i32>} : memref<2x1x128xf32, #tpu.memory_space<vmem>>, vector<1x1x128xf32>,
    %c1_54 = arith.constant 1 : index
    %c0_55 = arith.constant 0 : index
    %c0_56 = arith.constant 0 : index
    %98 = vector.load %arg6[%c1_54, %c0_55, %c0_56] : memref<2x1x128xf32, #tpu.memory_space<vmem>>, vector<1x1x128xf32>
    %99 = vector.shape_cast %98 : vector<1x1x128xf32> to vector<1x128xf32>
    %100 = vector.shape_cast %92 : vector<1x128xf32> to vector<1x1x128xf32>
    tpu.vector_store %arg6[%c1_54, %c0_55, %c0_56], %100 {strides = array<i32>} : memref<2x1x128xf32, #tpu.memory_space<vmem>>, vector<1x1x128xf32>,
    return
  }
  func.func @transform_0(%arg0: i32) -> (i32, i32, i32) {
    %c0_i32 = arith.constant 0 : i32
    %c0_i32_0 = arith.constant 0 : i32
    %c0_i32_1 = arith.constant 0 : i32
    return %c0_i32, %arg0, %c0_i32_0 : i32, i32, i32
  }
  func.func @transform_1(%arg0: i32) -> (i32, i32) {
    %c0_i32 = arith.constant 0 : i32
    %c0_i32_0 = arith.constant 0 : i32
    %c0_i32_1 = arith.constant 0 : i32
    return %c0_i32, %c0_i32_0 : i32, i32
  }
  func.func @transform_2(%arg0: i32) -> i32 {
    %c0_i32 = arith.constant 0 : i32
    %c0_i32_0 = arith.constant 0 : i32
    return %c0_i32 : i32
  }
  func.func @transform_3(%arg0: i32) -> (i32, i32) {
    %c0_i32 = arith.constant 0 : i32
    %c0_i32_0 = arith.constant 0 : i32
    %c0_i32_1 = arith.constant 0 : i32
    return %c0_i32, %c0_i32_0 : i32, i32
  }
  func.func @transform_4(%arg0: i32) -> i32 {
    %c0_i32 = arith.constant 0 : i32
    %c0_i32_0 = arith.constant 0 : i32
    return %c0_i32 : i32
  }
  func.func @transform_5(%arg0: i32) -> (i32, i32, i32) {
    %c0_i32 = arith.constant 0 : i32
    %c0_i32_0 = arith.constant 0 : i32
    %c0_i32_1 = arith.constant 0 : i32
    return %c0_i32, %arg0, %c0_i32_0 : i32, i32, i32
  }
}

</mosaic_0001>

<bundles_post_ra>
// kernel: tpu_custom_call.1
= control target key start
LH: loop header
LB: loop body
LE: loop exit
PB: predicated region body
PF: predicated region fallthrough
CT: control target
= control target key end

     0   :  { %10 = vsyncpa [#allocation4], 0  ;;  %s363_s0 = inlined_call_operand.vmem [shape: f32[6,1,128], index: 0, kind: input, shape index: {}]   ;;  %s364_s1 = inlined_call_operand.vmem [shape: f32[6,2], index: 1, kind: input, shape index: {}]   ;;  %s365_s2 = inlined_call_operand.vmem [shape: f32[2], index: 2, kind: input, shape index: {}]   ;;  %s366_s3 = inlined_call_operand.vmem [shape: f32[2,2], index: 3, kind: input, shape index: {}]   ;;  %s367_s4 = inlined_call_operand.vmem [shape: f32[2], index: 4, kind: input, shape index: {}]   ;;  %s368_s5 = inlined_call_operand.hbm [shape: f32[2,1,128], index: 5, kind: output, shape index: {}]  }
   0x1   :  { %11 = vsyncpa [#allocation6], 0 }
   0x2   :  { %12 = vsyncpa [#allocation9], 0  ;;  %s32_s20 = sshll.u32 %s365_s2, 4  ;;  %s33_s20 = int_to_ptr.vmem [resolvable:$true] %s32_s20 }
   0x3   :  { %13 = vsyncpa [#allocation3], 0  ;;  %s22_s23 = sshll.u32 %s364_s1, 4  ;;  %s214_s24 = scalar_lea.vmem %s33_s20, 16  ;;  %s23_s23 = int_to_ptr.vmem [resolvable:$true] %s22_s23 }
   0x4   :  { %p215_p0 = scmp.ne.s32.totalorder %s33_s20, %s214_s24  ;;  %p219_p1 = scmp.lt.s32.totalorder %s33_s20, %s33_s20 }
   0x5   :  { %p220_p2 = scmp.lt.s32.totalorder %s214_s24, %s214_s24 }
   0x7   :  { %p221_p3 = por %p220_p2, %p219_p1 }
   0x9   :  { %p222_p4 = pnand %p221_p3, %p215_p0 }
   0xb   :  { %225 = shalt.err (!%p222_p4)
}
   0xc   :  { %s290_s25 = smov [#allocation5]   ;;  %s226_s26 = scalar_lea.vmem %s23_s23, 128 }
   0xd   :  { %35 = dma.vmem_to_smem %s33_s20, 16, %s290_s25, [#allocation6]  }
   0xe   :  { %p227_p5 = scmp.ne.s32.totalorder %s23_s23, %s226_s26  ;;  %p231_p6 = scmp.lt.s32.totalorder %s23_s23, %s23_s23 }
   0xf   :  { %p232_p7 = scmp.lt.s32.totalorder %s226_s26, %s226_s26 }
  0x11   :  { %p233_p8 = por %p232_p7, %p231_p6 }
  0x13   :  { %p234_p9 = pnand %p233_p8, %p227_p5 }
  0x15   :  { %237 = shalt.err (!%p234_p9)
}
  0x16   :  { %s291_s2 = smov [#allocation2]   ;;  %s42_s28 = sshll.u32 %s366_s3, 4  ;;  %s43_s28 = int_to_ptr.vmem [resolvable:$true] %s42_s28 }
  0x17   :  { %25 = dma.vmem_to_smem %s23_s23, 128, %s291_s2, [#allocation4]  }
  0x18   :  { %s52_s6 = sshll.u32 %s367_s4, 4  ;;  %s238_s7 = scalar_lea.vmem %s43_s28, 32  ;;  %s53_s6 = int_to_ptr.vmem [resolvable:$true] %s52_s6 }
  0x19   :  { %p239_p10 = scmp.ne.s32.totalorder %s43_s28, %s238_s7  ;;  %p243_p11 = scmp.lt.s32.totalorder %s43_s28, %s43_s28 }
  0x1a   :  { %p244_p12 = scmp.lt.s32.totalorder %s238_s7, %s238_s7 }
  0x1c   :  { %p245_p13 = por %p244_p12, %p243_p11 }
  0x1e   :  { %p246_p0 = pnand %p245_p13, %p239_p10 }
  0x20   :  { %249 = shalt.err (!%p246_p0)
}
  0x21   :  { %s292_s8 = smov [#allocation7]   ;;  %s250_s9 = scalar_lea.vmem %s53_s6, 16 }
  0x22   :  { %45 = dma.vmem_to_smem %s43_s28, 32, %s292_s8, [#allocation6]  }
  0x23   :  { %p251_p1 = scmp.ne.s32.totalorder %s53_s6, %s250_s9  ;;  %p255_p2 = scmp.lt.s32.totalorder %s53_s6, %s53_s6 }
  0x24   :  { %p256_p3 = scmp.lt.s32.totalorder %s250_s9, %s250_s9 }
  0x26   :  { %p257_p4 = por %p256_p3, %p255_p2 }
  0x28   :  { %p258_p5 = pnand %p257_p4, %p251_p1 }
  0x2a   :  { %261 = shalt.err (!%p258_p5)
}
  0x2b   :  { %s293_s3 = smov [#allocation8]  }
  0x2c   :  { %55 = dma.vmem_to_smem %s53_s6, 16, %s293_s3, [#allocation9]  }
  0x2d   :  { %282 = dma.done.wait [#allocation4], 128  }
  0x2e   :  { %283 = vsyncadd [#allocation4], 4294967168 }
  0x2f   :  { %284 = dma.done.wait [#allocation6], 48  }
  0x30   :  { %285 = vsyncadd [#allocation6], 4294967248 }
  0x31   :  { %286 = dma.done.wait [#allocation9], 16  }
  0x32   :  { %287 = vsyncadd [#allocation9], 4294967280 }
  0x33   :  { %68 = sfence }
  0x34   :  { %s80_s4 = sld [smem:[#allocation2]]  ;;  %v69_v0 = vld [vmem:[%s363_s0] sm:$0x1]  ;;  %v182_v1 = vld [vmem:[%s363_s0 + $0x1] sm:$0x1] }
  0x35   :  { %s187_s10 = sld [smem:[#allocation2 + $0x80]]  ;;  %v183_v2 = vld [vmem:[%s363_s0 + $0x2] sm:$0x1]  ;;  %v184_v4 = vld [vmem:[%s363_s0 + $0x3] sm:$0x1] }
  0x36   :  { %s188_s11 = sld [smem:[#allocation2 + $0x100]]  ;;  %v185_v9 = vld [vmem:[%s363_s0 + $0x4] sm:$0x1]  ;;  %v186_v15 = vld [vmem:[%s363_s0 + $0x5] sm:$0x1] }
  0x37   :  { %s189_s12 = sld [smem:[#allocation2 + $0x180]] }
  0x38   :  { %s190_s15 = sld [smem:[#allocation2 + $0x200]] }
  0x39   :  { %s191_s18 = sld [smem:[#allocation2 + $0x280]] }
  0x3a   :  { %v81_v3 = vstv %s80_s4  ;;  %s348_s21 = sld [smem:[#allocation5]] }
  0x3b   :  { %v82_v5 = vmul.f32 %v81_v3, %v69_v0  ;;  %v84_v6 = vstv %s187_s10  ;;  %s192_s24 = sld [smem:[#allocation2 + $0x1]] }
  0x3c   :  { %v85_v7 = vmul.f32 %v182_v1, %v84_v6  ;;  %v88_v8 = vstv %s188_s11  ;;  %s193_s25 = sld [smem:[#allocation2 + $0x81]]  ;;  %s294_s11 = smov [#allocation10]  }
  0x3d   :  { %v89_v10 = vmul.f32 %v183_v2, %v88_v8  ;;  %v92_v11 = vstv %s189_s12  ;;  %s194_s1 = sld [smem:[#allocation2 + $0x101]]  ;;  %s168_s12 = sshll.u32 %s294_s11, 4  ;;  %s169_s12 = int_to_ptr.vmem [resolvable:$true] %s168_s12 }
  0x3e   :  { %v86_v12 = vadd.f32 %v85_v7, %v82_v5  ;;  %v93_v13 = vmul.f32 %v184_v4, %v92_v11  ;;  %v96_v14 = vstv %s190_s15  ;;  %s195_s27 = sld [smem:[#allocation2 + $0x181]]  ;;  %s262_s13 = scalar_lea.vmem %s169_s12, 32 }
  0x3f   :  { %v100_v16 = vstv %s191_s18  ;;  %s196_s30 = sld [smem:[#allocation2 + $0x201]]  ;;  %v97_v18 = vmul.f32 %v185_v9, %v96_v14  ;;  %p263_p6 = scmp.ne.s32.totalorder %s169_s12, %s262_s13 }
  0x40   :  { %v90_v17 = vadd.f32 %v89_v10, %v86_v12  ;;  %s197_s6 = sld [smem:[#allocation2 + $0x281]]  ;;  %v101_v21 = vmul.f32 %v186_v15, %v100_v16  ;;  %v104_v33 = vstv %s348_s21  ;;  %p267_p7 = scmp.lt.s32.totalorder %s169_s12, %s169_s12 }
  0x41   :  { %v108_v19 = vstv %s192_s24  ;;  %s198_s7 = sld [smem:[#allocation5 + $0x1]]  ;;  %p268_p8 = scmp.lt.s32.totalorder %s262_s13, %s262_s13 }
  0x42   :  { %v94_v20 = vadd.f32 %v93_v13, %v90_v17  ;;  %v109_v22 = vmul.f32 %v108_v19, %v69_v0  ;;  %v111_v23 = vstv %s193_s25  ;;  %s134_s0 = sld [smem:[#allocation7]] }
  0x43   :  { %v112_v24 = vmul.f32 %v182_v1, %v111_v23  ;;  %v115_v25 = vstv %s194_s1  ;;  %s200_s8 = sld [smem:[#allocation7 + $0x1]]  ;;  %p269_p9 = por %p268_p8, %p267_p7 }
  0x44   :  { %v98_v26 = vadd.f32 %v97_v18, %v94_v20  ;;  %v116_v27 = vmul.f32 %v183_v2, %v115_v25  ;;  %v119_v28 = vstv %s195_s27  ;;  %s199_s9 = sld [smem:[#allocation7 + $0x80]] }
  0x45   :  { %v113_v29 = vadd.f32 %v112_v24, %v109_v22  ;;  %v120_v30 = vmul.f32 %v184_v4, %v119_v28  ;;  %v123_v31 = vstv %s196_s30  ;;  %s201_s3 = sld [smem:[#allocation7 + $0x81]]  ;;  %p270_p10 = pnand %p269_p9, %p263_p6 }
  0x46   :  { %v102_v32 = vadd.f32 %v101_v21, %v98_v26  ;;  %v127_v34 = vstv %s197_s6  ;;  %v124_v36 = vmul.f32 %v185_v9, %v123_v31  ;;  %s141_s4 = sld [smem:[#allocation8]] }
  0x47   :  { %v117_v35 = vadd.f32 %v116_v27, %v113_v29  ;;  %v128_v39 = vmul.f32 %v186_v15, %v127_v34  ;;  %v131_v41 = vstv %s198_s7  ;;  %s202_s10 = sld [smem:[#allocation8 + $0x1]] }
  0x48   :  { %v105_v37 = vadd.f32 %v104_v33, %v102_v32  ;;  %v135_v44 = vstv %s134_s0 }
  0x49   :  { %v121_v38 = vadd.f32 %v120_v30, %v117_v35  ;;  %v145_v45 = vstv %s200_s8 }
  0x4a   :  { %v106_v42 = vmax.f32 %v105_v37, 0.0  ;;  %v138_v47 = vstv %s199_s9 }
  0x4b   :  { %v125_v40 = vadd.f32 %v124_v36, %v121_v38  ;;  %v148_v48 = vstv %s201_s3 }
  0x4c   :  { %v136_v50 = vmul.f32 %v135_v44, %v106_v42  ;;  %v146_v51 = vmul.f32 %v145_v45, %v106_v42  ;;  %v142_v54 = vstv %s141_s4 }
  0x4d   :  { %v129_v43 = vadd.f32 %v128_v39, %v125_v40  ;;  %v152_v55 = vstv %s202_s10 }
  0x4f   :  { %v132_v46 = vadd.f32 %v131_v41, %v129_v43 }
  0x51   :  { %v133_v49 = vmax.f32 %v132_v46, 0.0 }
  0x53   :  { %v139_v52 = vmul.f32 %v138_v47, %v133_v49  ;;  %v149_v53 = vmul.f32 %v148_v48, %v133_v49 }
  0x55   :  { %v140_v56 = vadd.f32 %v139_v52, %v136_v50  ;;  %v150_v57 = vadd.f32 %v149_v53, %v146_v51 }
  0x57   :  { %v143_v58 = vadd.f32 %v142_v54, %v140_v56  ;;  %v153_v59 = vadd.f32 %v152_v55, %v150_v57 }
  0x59   :  { %v154_v60 = vsub.f32 %v143_v58, %v153_v59 }
  0x5b   :  { %v155_v61 = vmul.f32 1.442695, %v154_v60 }
  0x5d   :  { %210 = vpow2.f32 %v155_v61 }
  0x6a   :  { %v211_v62 = vpop.eup %210 }
  0x6b   :  { %v157_v63 = vadd.f32 1.0, %v211_v62 }
  0x6d   :  { %212 = vrcp.f32 %v157_v63 }
  0x7a   :  { %v213_v0 = vpop.eup %212 }
  0x7b   :  { %v159_v1 = vsub.f32 1.0, %v213_v0  ;;  %162 = vst [vmem:[#allocation10 + $0x1] sm:$0x1] %v213_v0 }
  0x7d   :  { %160 = vst [vmem:[#allocation10] sm:$0x1] %v159_v1 }
  0x7e   :  { %273 = shalt.err (!%p270_p10)
}
  0x7f   :  { %s295_s14 = smov 16   ;;  %s296_s15 = smov 1  }
  0x80   :  { %174 = dma.vmem_to_hbm [thread:$0]  %s169_s12, 32, %s368_s5, [#allocation3], %s295_s14, %s295_s14, %s296_s15  }
  0x81   :  { %288 = dma.done.wait [#allocation3], 32  }
  0x82   :  { %289 = vsyncadd [#allocation3], 4294967264 }
  0x83   :  { %178 = vsyncpa [#allocation3], 1 }
  0x84   :  { %179 = vsyncpa [#allocation4], 1 }
  0x85   :  { %180 = vsyncpa [#allocation6], 1 }
  0x86   :  { %181 = vsyncpa [#allocation9], 1 }

</bundles_post_ra>
